<compile_context>
chip_gen: v7x
topology: tpu7x:2x2x1
jax: 0.10.0
libtpu: 0.0.40
codegen_flags: <defaults>
</compile_context>

<pallas_src>
import jax
import jax.numpy as jnp
from jax.experimental import pallas as pl
from jax.experimental.pallas import tpu as pltpu


_VMEM_BLOCK_BUDGET = 16 * 1024 * 1024   # bytes used to size block_B (conservative)
_VMEM_LIMIT_BYTES = 48 * 1024 * 1024    # scoped VMEM limit: > v5e 16MiB default, < v7x 64MiB


def _pick_block_b(batch, c, t_pad, o, t_out):
    """Batch elements per grid step: as many as fit the VMEM budget, balanced,
    and capped so there are >= 2 grid steps (v7x has 2 TensorCores)."""
    in_bytes = c * t_pad * 4
    out_bytes = o * t_out * 4
    # 2x double-buffered input block + 2x double-buffered output block
    # + ~3 output-sized f32 temporaries (acc / y / scaled product).
    per_elem = 2 * in_bytes + 5 * out_bytes
    bb = max(1, _VMEM_BLOCK_BUDGET // per_elem)
    if batch >= 2:
        bb = min(bb, -(-batch // 2))          # keep n_blocks >= 2 for megacore
    bb = min(bb, batch)
    n_blocks = -(-batch // bb)
    bb = -(-batch // n_blocks)                # balance blocks -> minimal batch pad
    return bb, n_blocks


def standard_cnn1d_eca(x, conv_w, conv_b, eca_w, *, stride, padding):
    """x: (B, C, T) NCW.  conv_w: (O, C, K).  conv_b: (O,).  eca_w: (1, 1, k_eca).

    Returns (B, O, T_out) NCW (same layout as the PyTorch module).
    """
    B, C, T = x.shape
    O, _, K = conv_w.shape
    T_out = (T + 2 * padding - K) // stride + 1

    # Pad the time dim so every tap slice stays in-bounds (zeros = 'zeros' pad mode).
    t_needed = (T_out - 1) * stride + K
    right_pad = max(0, t_needed - padding - T)
    T_padded = padding + T + right_pad

    block_B, n_blocks = _pick_block_b(B, C, T_padded, O, T_out)
    B_pad = block_B * n_blocks

    # ---- cheap XLA-side glue (pad minor time dim fused with cast; tiny weights) ----
    x_p = jnp.pad(x.astype(jnp.float32),
                  ((0, B_pad - B), (0, 0), (padding, right_pad)))   # (B_pad, C, T_padded)
    w_koc = jnp.transpose(conv_w, (2, 0, 1)).astype(jnp.float32)    # (K, O, C)
    b2d = conv_b.reshape(O, 1).astype(jnp.float32)                  # (O, 1)

    # Banded matrix for the ECA channel conv (zero-padded cross-correlation):
    #   out[j] = sum_i att[i] * M[i, j],  M[i, j] = w_eca[i - j + pad_eca].
    k_eca = eca_w.shape[-1]
    pad_eca = (k_eca - 1) // 2
    ii = jnp.arange(O)[:, None]
    jj = jnp.arange(O)[None, :]
    dd = ii - jj + pad_eca
    valid = (dd >= 0) & (dd < k_eca)
    w_flat = eca_w.reshape(k_eca).astype(jnp.float32)
    m_eca = jnp.where(valid, w_flat[jnp.clip(dd, 0, k_eca - 1)], 0.0)   # (O, O)

    def kernel(x_ref, w_ref, b_ref, m_ref, out_ref):
        bb = block_B
        # --- Conv1d: K taps, each a batched (O,C)x(C,T_out) MXU matmul in NCW.
        #     Time stays in the lane dim end-to-end; no transposes anywhere.
        acc = jnp.zeros((bb, O, T_out), dtype=jnp.float32)
        for k in range(K):
            if stride == 1:
                xk = x_ref[:, :, pl.ds(k, T_out)]                   # (bb, C, T_out)
            else:
                # TODO(synk): stride > 1 strided lane slicing untested on hardware.
                xk = x_ref[:, :, pl.ds(k, T_out, stride)]
            wk = jnp.broadcast_to(w_ref[k][None, :, :], (bb, O, C))  # tiny broadcast
            acc = acc + jax.lax.dot_general(
                wk, xk,
                dimension_numbers=(((2,), (1,)), ((0,), (0,))),
                preferred_element_type=jnp.float32)
        y = acc + b_ref[...][None, :, :]                            # (bb, O, T_out)

        # --- EfficientChannelAttention (spatial_channels=1, mask=None) ---
        att = jnp.mean(y, axis=2)                                   # adaptive_avg_pool1d -> (bb, O)
        # 3-tap channel conv as one tiny banded matmul (MXU slack).
        att = jnp.dot(att, m_ref[...], preferred_element_type=jnp.float32)
        att = 1.0 / (1.0 + jnp.exp(-att))                           # sigmoid
        # post_scale: channels / sum over channels (exact divide; off critical path).
        att = att * (jnp.float32(O) / jnp.sum(att, axis=1, keepdims=True))

        # --- single lane-dense NCW store (no per-batch loop, no transpose) ---
        out_ref[...] = (y * att[:, :, None]).astype(out_ref.dtype)

    out = pl.pallas_call(
        kernel,
        out_shape=jax.ShapeDtypeStruct((B_pad, O, T_out), jnp.float32),
        grid_spec=pltpu.PrefetchScalarGridSpec(
            num_scalar_prefetch=0,
            grid=(n_blocks,),
            in_specs=[
                pl.BlockSpec((block_B, C, T_padded), lambda i: (i, 0, 0)),
                pl.BlockSpec((K, O, C), lambda i: (0, 0, 0)),       # constant-index
                pl.BlockSpec((O, 1), lambda i: (0, 0)),             # constant-index
                pl.BlockSpec((O, O), lambda i: (0, 0)),             # constant-index
            ],
            out_specs=pl.BlockSpec((block_B, O, T_out), lambda i: (i, 0, 0)),
        ),
        compiler_params=pltpu.CompilerParams(
            dimension_semantics=("parallel",),
            vmem_limit_bytes=_VMEM_LIMIT_BYTES),
    )(x_p, w_koc, b2d, m_eca)

    return out[:B] if B_pad != B else out


def _reference(x, conv_w, conv_b, eca_w, *, stride, padding):
    """Pure-JAX reference reproducing the PyTorch forward semantics (mask=None)."""
    y = jax.lax.conv_general_dilated(
        x, conv_w, window_strides=(stride,), padding=[(padding, padding)],
        dimension_numbers=("NCH", "OIH", "NCH"))
    y = y + conv_b[None, :, None]                            # (B, O, T_out)
    att = jnp.mean(y, axis=-1, keepdims=True)                # (B, O, 1)
    att = att.transpose(0, 2, 1)                             # (B, 1, O)
    k = eca_w.shape[-1]
    att = jax.lax.conv_general_dilated(
        att, eca_w, window_strides=(1,), padding=[((k - 1) // 2, (k - 1) // 2)],
        dimension_numbers=("NCH", "OIH", "NCH"))
    att = att.transpose(0, 2, 1)                             # (B, O, 1)
    att = jax.nn.sigmoid(att)
    scale = y.shape[1] / jnp.sum(att, axis=1, keepdims=True)
    att = scale * att
    return y * att


if __name__ == "__main__":
    # Small shapes consistent with the module: batch=2, in_channels=4,
    # seq length=16, out_channels=32, conv kernel=3, stride=1, padding=1.
    B, C_in, T = 2, 4, 16
    O, K = 32, 3
    stride, padding = 1, 1
    k_eca = 3

    key = jax.random.PRNGKey(0)
    kx, kw, kb, ke = jax.random.split(key, 4)
    x = jax.random.normal(kx, (B, C_in, T), dtype=jnp.float32)
    conv_w = jax.random.normal(kw, (O, C_in, K), dtype=jnp.float32) * 0.1
    conv_b = jax.random.normal(kb, (O,), dtype=jnp.float32) * 0.1
    eca_w = jax.random.normal(ke, (1, 1, k_eca), dtype=jnp.float32) * 0.5

    out = standard_cnn1d_eca(x, conv_w, conv_b, eca_w, stride=stride, padding=padding)
    out = jax.block_until_ready(out)

    ref = _reference(x, conv_w, conv_b, eca_w, stride=stride, padding=padding)
    ref = jax.block_until_ready(ref)

    T_out = (T + 2 * padding - K) // stride + 1
    assert out.shape == (B, O, T_out), out.shape
    # Tolerance covers only MXU default-precision f32 matmul passes vs the XLA
    # reference conv (post_scale now uses an exact divide).
    assert jnp.allclose(out, ref, atol=2e-3, rtol=2e-3), (
        f"max abs diff {jnp.max(jnp.abs(out - ref))}")

    print("KERNEL_OK")
</pallas_src>

<mosaic_0001>
module attributes {stable_mosaic.version = 11 : i64} {
  func.func @kernel(%arg0: i32, %arg1: memref<1x4x18xf32, #tpu.memory_space<vmem>>, %arg2: memref<3x32x4xf32, #tpu.memory_space<vmem>>, %arg3: memref<32x1xf32, #tpu.memory_space<vmem>>, %arg4: memref<32x32xf32, #tpu.memory_space<vmem>>, %arg5: memref<1x32x16xf32, #tpu.memory_space<vmem>>) attributes {dimension_semantics = [#tpu.dimension_semantics<parallel>], iteration_bounds = array<i64: 2>, scalar_prefetch = 0 : i64, scratch_operands = 0 : i64, tpu.core_type = #tpu.core_type<tc>, window_params = [{transform_indices = @transform_0, window_bounds = array<i64: 1, 4, 18>}, {pipeline_mode = #tpu.pipeline_mode<synchronous>, transform_indices = @transform_1, window_bounds = array<i64: 3, 32, 4>}, {pipeline_mode = #tpu.pipeline_mode<synchronous>, transform_indices = @transform_2, window_bounds = array<i64: 32, 1>}, {pipeline_mode = #tpu.pipeline_mode<synchronous>, transform_indices = @transform_3, window_bounds = array<i64: 32, 32>}, {transform_indices = @transform_4, window_bounds = array<i64: 1, 32, 16>}]} {
    %cst = arith.constant 0.000000e+00 : f32
    %0 = vector.broadcast %cst : f32 to vector<1x32x16xf32>
    %c0 = arith.constant 0 : index
    %c0_0 = arith.constant 0 : index
    %c0_1 = arith.constant 0 : index
    %1 = vector.load %arg1[%c0, %c0_0, %c0_1] : memref<1x4x18xf32, #tpu.memory_space<vmem>>, vector<1x4x16xf32>
    %c0_2 = arith.constant 0 : index
    %c0_3 = arith.constant 0 : index
    %c0_4 = arith.constant 0 : index
    %2 = vector.load %arg2[%c0_2, %c0_3, %c0_4] : memref<3x32x4xf32, #tpu.memory_space<vmem>>, vector<1x32x4xf32>
    %3 = vector.shape_cast %2 : vector<1x32x4xf32> to vector<32x4xf32>
    %4 = vector.shape_cast %3 : vector<32x4xf32> to vector<1x32x4xf32>
    %cst_5 = arith.constant dense<0.000000e+00> : vector<1x32x16xf32>
    %5 = tpu.matmul %4, %1, %cst_5 {dimension_numbers = #tpu.dot_dimension_numbers<[2], [1], [1], [2], [0, 0, 0, 1, 1, 2], [0], [0]>} : vector<1x32x4xf32>, vector<1x4x16xf32>, vector<1x32x16xf32> -> vector<1x32x16xf32>
    %6 = arith.addf %0, %5 : vector<1x32x16xf32>
    %c0_6 = arith.constant 0 : index
    %c0_7 = arith.constant 0 : index
    %c1 = arith.constant 1 : index
    %7 = vector.load %arg1[%c0_6, %c0_7, %c1] : memref<1x4x18xf32, #tpu.memory_space<vmem>>, vector<1x4x16xf32>
    %c1_8 = arith.constant 1 : index
    %c0_9 = arith.constant 0 : index
    %c0_10 = arith.constant 0 : index
    %8 = vector.load %arg2[%c1_8, %c0_9, %c0_10] : memref<3x32x4xf32, #tpu.memory_space<vmem>>, vector<1x32x4xf32>
    %9 = vector.shape_cast %8 : vector<1x32x4xf32> to vector<32x4xf32>
    %10 = vector.shape_cast %9 : vector<32x4xf32> to vector<1x32x4xf32>
    %cst_11 = arith.constant dense<0.000000e+00> : vector<1x32x16xf32>
    %11 = tpu.matmul %10, %7, %cst_11 {dimension_numbers = #tpu.dot_dimension_numbers<[2], [1], [1], [2], [0, 0, 0, 1, 1, 2], [0], [0]>} : vector<1x32x4xf32>, vector<1x4x16xf32>, vector<1x32x16xf32> -> vector<1x32x16xf32>
    %12 = arith.addf %6, %11 : vector<1x32x16xf32>
    %c0_12 = arith.constant 0 : index
    %c0_13 = arith.constant 0 : index
    %c2 = arith.constant 2 : index
    %13 = vector.load %arg1[%c0_12, %c0_13, %c2] : memref<1x4x18xf32, #tpu.memory_space<vmem>>, vector<1x4x16xf32>
    %c2_14 = arith.constant 2 : index
    %c0_15 = arith.constant 0 : index
    %c0_16 = arith.constant 0 : index
    %14 = vector.load %arg2[%c2_14, %c0_15, %c0_16] : memref<3x32x4xf32, #tpu.memory_space<vmem>>, vector<1x32x4xf32>
    %15 = vector.shape_cast %14 : vector<1x32x4xf32> to vector<32x4xf32>
    %16 = vector.shape_cast %15 : vector<32x4xf32> to vector<1x32x4xf32>
    %cst_17 = arith.constant dense<0.000000e+00> : vector<1x32x16xf32>
    %17 = tpu.matmul %16, %13, %cst_17 {dimension_numbers = #tpu.dot_dimension_numbers<[2], [1], [1], [2], [0, 0, 0, 1, 1, 2], [0], [0]>} : vector<1x32x4xf32>, vector<1x4x16xf32>, vector<1x32x16xf32> -> vector<1x32x16xf32>
    %18 = arith.addf %12, %17 : vector<1x32x16xf32>
    %c0_18 = arith.constant 0 : index
    %c0_19 = arith.constant 0 : index
    %19 = vector.load %arg3[%c0_18, %c0_19] : memref<32x1xf32, #tpu.memory_space<vmem>>, vector<32x1xf32>
    %20 = vector.shape_cast %19 : vector<32x1xf32> to vector<1x32x1xf32>
    %21 = vector.broadcast %20 : vector<1x32x1xf32> to vector<1x32x16xf32>
    %22 = arith.addf %18, %21 : vector<1x32x16xf32>
    %cst_20 = arith.constant dense<0.000000e+00> : vector<1x32xf32>
    %23 = vector.multi_reduction <add>, %22, %cst_20 [2] : vector<1x32x16xf32> to vector<1x32xf32>
    %cst_21 = arith.constant 1.600000e+01 : f32
    %24 = vector.broadcast %cst_21 : f32 to vector<1x32xf32>
    %25 = arith.divf %23, %24 : vector<1x32xf32>
    %c0_22 = arith.constant 0 : index
    %c0_23 = arith.constant 0 : index
    %26 = vector.load %arg4[%c0_22, %c0_23] : memref<32x32xf32, #tpu.memory_space<vmem>>, vector<32x32xf32>
    %cst_24 = arith.constant dense<0.000000e+00> : vector<1x32xf32>
    %27 = tpu.matmul %25, %26, %cst_24 {dimension_numbers = #tpu.dot_dimension_numbers<[1], [0], [0], [1], [0, 0, 1, 1], [], []>} : vector<1x32xf32>, vector<32x32xf32>, vector<1x32xf32> -> vector<1x32xf32>
    %cst_25 = arith.constant 0.000000e+00 : f32
    %28 = vector.broadcast %cst_25 : f32 to vector<1x32xf32>
    %29 = arith.subf %28, %27 : vector<1x32xf32>
    %30 = math.exp %29 : vector<1x32xf32>
    %cst_26 = arith.constant 1.000000e+00 : f32
    %31 = vector.broadcast %cst_26 : f32 to vector<1x32xf32>
    %32 = arith.addf %31, %30 : vector<1x32xf32>
    %cst_27 = arith.constant 1.000000e+00 : f32
    %33 = vector.broadcast %cst_27 : f32 to vector<1x32xf32>
    %34 = arith.divf %33, %32 : vector<1x32xf32>
    %cst_28 = arith.constant dense<0.000000e+00> : vector<1xf32>
    %35 = vector.multi_reduction <add>, %34, %cst_28 [1] : vector<1x32xf32> to vector<1xf32>
    %36 = vector.shape_cast %35 : vector<1xf32> to vector<1x1xf32>
    %cst_29 = arith.constant 3.200000e+01 : f32
    %37 = vector.broadcast %cst_29 : f32 to vector<1x1xf32>
    %38 = arith.divf %37, %36 : vector<1x1xf32>
    %39 = vector.broadcast %38 : vector<1x1xf32> to vector<1x32xf32>
    %40 = arith.mulf %34, %39 : vector<1x32xf32>
    %41 = vector.shape_cast %40 : vector<1x32xf32> to vector<1x32x1xf32>
    %42 = vector.broadcast %41 : vector<1x32x1xf32> to vector<1x32x16xf32>
    %43 = arith.mulf %22, %42 : vector<1x32x16xf32>
    %c0_30 = arith.constant 0 : index
    %c0_31 = arith.constant 0 : index
    %c0_32 = arith.constant 0 : index
    %44 = vector.load %arg5[%c0_30, %c0_31, %c0_32] : memref<1x32x16xf32, #tpu.memory_space<vmem>>, vector<1x32x16xf32>
    tpu.vector_store %arg5[%c0_30, %c0_31, %c0_32], %43 {strides = array<i32>} : memref<1x32x16xf32, #tpu.memory_space<vmem>>, vector<1x32x16xf32>,
    return
  }
  func.func @transform_0(%arg0: i32) -> (i32, i32, i32) {
    %c0_i32 = arith.constant 0 : i32
    %c0_i32_0 = arith.constant 0 : i32
    %c0_i32_1 = arith.constant 0 : i32
    return %arg0, %c0_i32, %c0_i32_0 : i32, i32, i32
  }
  func.func @transform_1(%arg0: i32) -> (i32, i32, i32) {
    %c0_i32 = arith.constant 0 : i32
    %c0_i32_0 = arith.constant 0 : i32
    %c0_i32_1 = arith.constant 0 : i32
    %c0_i32_2 = arith.constant 0 : i32
    return %c0_i32, %c0_i32_0, %c0_i32_1 : i32, i32, i32
  }
  func.func @transform_2(%arg0: i32) -> (i32, i32) {
    %c0_i32 = arith.constant 0 : i32
    %c0_i32_0 = arith.constant 0 : i32
    %c0_i32_1 = arith.constant 0 : i32
    return %c0_i32, %c0_i32_0 : i32, i32
  }
  func.func @transform_3(%arg0: i32) -> (i32, i32) {
    %c0_i32 = arith.constant 0 : i32
    %c0_i32_0 = arith.constant 0 : i32
    %c0_i32_1 = arith.constant 0 : i32
    return %c0_i32, %c0_i32_0 : i32, i32
  }
  func.func @transform_4(%arg0: i32) -> (i32, i32, i32) {
    %c0_i32 = arith.constant 0 : i32
    %c0_i32_0 = arith.constant 0 : i32
    %c0_i32_1 = arith.constant 0 : i32
    return %arg0, %c0_i32, %c0_i32_0 : i32, i32, i32
  }
}

</mosaic_0001>

<bundles_post_ra>
// kernel: tpu_custom_call.1
= control target key start
LH: loop header
LB: loop body
LE: loop exit
PB: predicated region body
PF: predicated region fallthrough
CT: control target
= control target key end

     0   :  { %s932_s15 = smov 0   ;;  %s1055_s0 = inlined_call_operand.vmem [shape: f32[2,4,18], index: 0, kind: input, shape index: {}]   ;;  %s1056_s1 = inlined_call_operand.vmem [shape: f32[3,32,4], index: 1, kind: input, shape index: {}]   ;;  %s1057_s2 = inlined_call_operand.vmem [shape: f32[32,1], index: 2, kind: input, shape index: {}]   ;;  %s1058_s3 = inlined_call_operand.vmem [shape: f32[32,32], index: 3, kind: input, shape index: {}]   ;;  %s1059_s4 = inlined_call_operand.vmem [shape: f32[2,32,16], index: 4, kind: output, shape index: {}]  }
   0x1 LB: > { %s767_s16 = sadd.s32 4294967295, %s899_s15   ;;  %p771_p0 = scmp.ge.s32.totalorder %s899_s15, 1  ;;  %s899_s15 = sphi %s932_s15, %s14_s15  }
   0x2   : > { %p161_p1 = scmp.lt.s32.totalorder %s899_s15, 3 }
   0x4   : > { %p162_p2 = pnand %p771_p0, %p161_p1 }
   0x5   : > { %p186_p3 = scmp.lt.s32.totalorder (!%p162_p2), %s767_s16, 1  ;;  %v196_v0 = vld [vmem:[%s1056_s1] sm:$0xff] (!%p162_p2)  ;;  %vm208_vm0 = vcmask (!%p162_p2), 31744   ;;  %vm221_vm1 = vcmask (!%p162_p2), 1043456   ;;  %v901_v3 = vmov (!%p162_p2), 0   ;;  %v197_v5 = vld [vmem:[%s1056_s1 + $0x8] sm:$0xff] (!%p162_p2)  ;;  %v572_v52 = vlaneseq (!%p162_p2) }
   0x6   : > { %165 = sbr.rel (%p162_p2) target bundleno = 1034 (0x40a), region = 36  ;;  %832 = vmatprep.mubr.msk.f32.mxu0 (!%p162_p2), %vm208_vm0, %v196_v0  ;;  %v775_v1 = vld [vmem:[%s1056_s1 + $0x20] sm:$0xff] (!%p162_p2)  ;;  %885 = vset.pattern.permute.xlu1 (!%p162_p2), %v901_v3  ;;  %s902_s29 = smov (!%p162_p2), 127   ;;  %v198_v6 = vld [vmem:[%s1056_s1 + $0x10] sm:$0xff] (!%p162_p2)  ;;  %v519_v7 = vld [vmem:[%s1057_s2 + $0x8] sm:$0xff] (!%p162_p2)  ;;  %vm546_vm2 = vcmask (!%p162_p2), 130048  }
   0x7   : > { %824 = vmatprep.mubr.msk.f32.mxu1 (!%p162_p2), %vm208_vm0, %v775_v1  ;;  %v518_v2 = vld [vmem:[%s1057_s2] sm:$0xff] (!%p162_p2)  ;;  %886 = vset.pattern.permute.xlu0 (!%p162_p2), %v901_v3  ;;  %v199_v8 = vld [vmem:[%s1056_s1 + $0x18] sm:$0xff] (!%p162_p2)  ;;  %s903_s10 = smov (!%p162_p2), 126   ;;  %v520_v11 = vld [vmem:[%s1057_s2 + $0x10] sm:$0xff] (!%p162_p2)  ;;  %v904_v47 = vmov (!%p162_p2), 0.0|0.0   ;;  %vm905_vm3 = vmmov (!%p162_p2), 0  }
   0x8   : > { %524 = vperm.xlu1 (!%p162_p2), %885, %v518_v2   ;;  %v789_v9 = vld [vmem:[%s1056_s1 + $0x40] sm:$0xff] (!%p162_p2)  ;;  %v521_v10 = vld [vmem:[%s1057_s2 + $0x18] sm:$0xff] (!%p162_p2)  ;;  %v776_v13 = vld [vmem:[%s1056_s1 + $0x28] sm:$0xff] (!%p162_p2)  ;;  %v906_v51 = vmov (!%p162_p2), 0.0   ;;  %v573_v53 = vand.u32 (!%p162_p2), 127, %v572_v52  ;;  %v575_v54 = vshrl.u32 (!%p162_p2), %v572_v52, 7 }
   0x9   : > { %v777_v14 = vld [vmem:[%s1056_s1 + $0x30] sm:$0xff] (!%p162_p2)  ;;  %v790_v16 = vld [vmem:[%s1056_s1 + $0x48] sm:$0xff] (!%p162_p2)  ;;  %v778_v17 = vld [vmem:[%s1056_s1 + $0x38] sm:$0xff] (!%p162_p2)  ;;  %vm583_vm4 = vcmask (!%p162_p2), 130112   ;;  %vm590_vm5 = vcmask (!%p162_p2), 195712   ;;  %vm597_vm6 = vcmask (!%p162_p2), 261312  }
   0xa   : > { %v791_v18 = vld [vmem:[%s1056_s1 + $0x50] sm:$0xff] (!%p162_p2)  ;;  %v792_v19 = vld [vmem:[%s1056_s1 + $0x58] sm:$0xff] (!%p162_p2)  ;;  %v564_v44 = vld [vmem:[%s1058_s3] sm:$0xff] (!%p162_p2)  ;;  %v578_v55 = vadd.s32 (!%p162_p2), 4294967288, %v573_v53  ;;  %v592_v57 = vadd.s32 (!%p162_p2), 4294967272, %v573_v53  ;;  %v585_v58 = vadd.s32 (!%p162_p2), 4294967280, %v573_v53  ;;  %v576_v61 = vsub.s32 (!%p162_p2), %v573_v53, %v575_v54 }
   0xb   : > { %v565_v45 = vld [vmem:[%s1058_s3 + $0x8] sm:$0xff] (!%p162_p2)  ;;  %v566_v48 = vld [vmem:[%s1058_s3 + $0x10] sm:$0xff] (!%p162_p2)  ;;  %v567_v49 = vld [vmem:[%s1058_s3 + $0x18] sm:$0xff] (!%p162_p2)  ;;  %vm599_vm7 = vcmask (!%p162_p2), 261120   ;;  %vm678_vm8 = vcmask (!%p162_p2), 253952  }
   0xc   : > { %529 = vperm.xlu1 (!%p162_p2), %885, %v519_v7   ;;  %v858_v46 = vpack.c.bf16 (!%p162_p2), %v565_v45, %v564_v44  ;;  %v861_v50 = vpack.c.bf16 (!%p162_p2), %v567_v49, %v566_v48  ;;  %v581_v59 = vsub.s32 (!%p162_p2), %v578_v55, %v575_v54  ;;  %v595_v0 = vsub.s32 (!%p162_p2), %v592_v57, %v575_v54 }
   0xd   : > { %s1061_s16 = smov (!%p186_p3, %s767_s16), 1  ;;  %v588_v1 = vsub.s32 %v585_v58, %v575_v54 }
   0xe   : > { %s772_s21 = sshll.u32 %s1061_s16, 2  ;;  %s801_s13 = sshll.u32 %s1061_s16, 5 }
   0xf   : > { %s189_s26 = scalar_lea.vmem %s1055_s0, %s772_s21  ;;  %s194_s18 = scalar_lea.vmem %s1059_s4, %s801_s13 }
  0x10   : > { %v195_v4 = vld [vmem:[%s189_s26] sm:$0xf]  ;;  %539 = vperm.xlu1 %885, %v521_v10  }
  0x11   : > { %206 = vrot.lane.b32.xlu0 %v195_v4, %s902_s29  ;;  %830 = vmatprep.subr.msk.mxu0 %vm221_vm1, %v195_v4 }
  0x12   : > { %831 = vmatpush3.msk.msra.mxu0 %vm221_vm1, %v195_v4 }
  0x13   : > { %833 = vmatmul.mubr.msk.f32.vlgmr.msra.gmra.mrb[0].mxu0 %vm208_vm0, %v197_v5 }
  0x14   : > { %835 = vmatprep.mubr.msk.f32.mxu0 %vm208_vm0, %v198_v6 }
  0x15   : > { %413 = vrot.lane.b32.xlu0 %v195_v4, %s903_s10 }
  0x17   : > { %836 = vmatmul.mubr.msk.f32.gmra.mrb[2].mxu0 %vm208_vm0, %v199_v8 }
  0x18   : > { %840 = vmatprep.mubr.msk.f32.mxu0 %vm208_vm0, %v789_v9 }
  0x19   : > { %534 = vperm.xlu0 %886, %v520_v11  }
  0x83   : > { %v207_v12 = vpop.permute.xlu0 %206 }
  0x84   : > { %822 = vmatprep.subr.msk.mxu1 %vm221_vm1, %v207_v12 }
  0x85   : > { %823 = vmatpush3.msk.msra.mxu1 %vm221_vm1, %v207_v12 }
  0x86   : > { %825 = vmatmul.mubr.msk.f32.vlgmr.msra.gmra.mrb[0].mxu1 %vm208_vm0, %v776_v13  ;;  %857 = vmatprep.subr.bf16.mxu1 %v904_v47 }
  0x87   : > { %v414_v15 = vpop.permute.xlu0 %413  ;;  %827 = vmatprep.mubr.msk.f32.mxu1 %vm208_vm0, %v777_v14  ;;  %v525_v20 = vpop.permute.xlu1 %524  ;;  %859 = vmatpush3.bf16.msra.mxu1 %v858_v46 }
  0x88   : > { %838 = vmatprep.subr.msk.mxu0 %vm221_vm1, %v414_v15  ;;  %860 = vmatprep.subr.bf16.mxu1 %v904_v47 }
  0x89   : > { %839 = vmatpush3.msk.msra.mxu0 %vm221_vm1, %v414_v15 }
  0x8a   : > { %841 = vmatmul.mubr.msk.f32.vlgmr.msra.gmra.mrb[0].mxu0 %vm208_vm0, %v790_v16  ;;  %828 = vmatmul.mubr.msk.f32.gmra.mrb[2].mxu1 %vm208_vm0, %v778_v17 }
  0x8b   : > { %843 = vmatprep.mubr.msk.f32.mxu0 %vm208_vm0, %v791_v18  ;;  %v530_v23 = vpop.permute.xlu1 %529  ;;  %862 = vmatpush3.bf16.msra.mxu1 %v861_v50 }
  0x8c   : > { %854 = vmatprep.mubr.msk.f32.mxu1 %vm905_vm3, %v906_v51 }
  0x8e   : > { %844 = vmatmul.mubr.msk.f32.gmra.mrb[2].mxu0 %vm208_vm0, %v792_v19 }
  0x8f   : > { %v540_v38 = vpop.permute.xlu1 %539 }
  0x98   : > { %v535_v36 = vpop.permute.xlu0 %534 }
 0x159   : > { %v826_v21 = vpop.f32.mrb[0].mxu1 }
 0x15a   : > { %v290_v22 = vpop.f32.mrb[1].mxu1 }
 0x15d   : > { %v842_v24 = vpop.f32.mrb[0].mxu0  ;;  %v829_v25 = vpop.f32.mrb[2].mxu1 }
 0x15e   : > { %v863_v26 = vadd.f32 %v842_v24, %v826_v21  ;;  %v495_v27 = vpop.f32.mrb[1].mxu0  ;;  %v300_v28 = vpop.f32.mrb[3].mxu1 }
 0x15f   : > { %v864_v29 = vadd.f32 %v495_v27, %v290_v22 }
 0x160   : > { %v1012_v30 = vadd.f32 %v863_v26, %v530_v23  ;;  %v687_v23 = vsub.s32 0, %v575_v54 }
 0x161   : > { %v845_v31 = vpop.f32.mrb[2].mxu0  ;;  %v1014_v32 = vadd.f32 %v864_v29, %v525_v20 }
 0x162   : > { %v865_v33 = vadd.f32 %v845_v31, %v829_v25  ;;  %v505_v34 = vpop.f32.mrb[3].mxu0  ;;  %v550_v35 = vsel %vm546_vm2, %v1012_v30, 0.0 }
 0x163   : > { %v866_v37 = vadd.f32 %v505_v34, %v300_v28  ;;  %551 = vadd.xlane.f32.xlu0 %v550_v35  ;;  %v547_v39 = vsel %vm546_vm2, %v1014_v32, 0.0 }
 0x164   : > { %v1020_v40 = vadd.f32 %v865_v33, %v540_v38  ;;  %548 = vadd.xlane.f32.xlu1 %v547_v39 }
 0x165   : > { %v1022_v41 = vadd.f32 %v866_v37, %v535_v36 }
 0x166   : > { %v556_v42 = vsel %vm546_vm2, %v1020_v40, 0.0 }
 0x167   : > { %v553_v43 = vsel %vm546_vm2, %v1022_v41, 0.0 }
 0x168   : > { %557 = vadd.xlane.f32.xlu1 %v556_v42  ;;  %554 = vadd.xlane.f32.xlu0 %v553_v43 }
 0x1f0   : > { %v552_v56 = vpop.xlane.xlu0 %551 }
 0x1f1   : > { %v561_v60 = vmul.f32 0.0625, %v552_v56  ;;  %v549_v62 = vpop.xlane.xlu1 %548 }
 0x1f2   : > { %v560_v63 = vmul.f32 0.0625, %v549_v62 }
 0x1f3   : > { %v582_v2 = vrot.slane %v561_v60, %v581_v59 }
 0x1f4   : > { %v577_v3 = vrot.slane %v560_v63, %v576_v61 }
 0x1f5   : > { %v558_v4 = vpop.xlane.xlu1 %557  ;;  %v555_v5 = vpop.xlane.xlu0 %554 }
 0x1f6   : > { %v563_v6 = vmul.f32 0.0625, %v558_v4  ;;  %v562_v7 = vmul.f32 0.0625, %v555_v5  ;;  %v584_v10 = vsel %vm583_vm4, %v582_v2, %v577_v3 }
 0x1f8   : > { %v596_v8 = vrot.slane %v563_v6, %v595_v0  ;;  %v589_v9 = vrot.slane %v562_v7, %v588_v1 }
 0x1fa   : > { %v591_v11 = vsel %vm590_vm5, %v589_v9, %v584_v10 }
 0x1fb   : > { %v598_v12 = vsel %vm597_vm6, %v596_v8, %v591_v11 }
 0x1fc   : > { %855 = vmatmul.mubr.msk.f32.vlgmr.msra.gmra.mrb[4].mxu1 %vm599_vm7, %v598_v12 }
 0x2cf   : > { %v668_v13 = vpop.f32.mrb[4].mxu1 }
 0x2d0   : > { %v672_v14 = vsub.f32 0.0, %v668_v13  ;;  %v856_v15 = vpop.f32.mrb[5].mxu1 }
 0x2d2   : > { %v673_v16 = vmul.f32 1.442695, %v672_v14 }
 0x2d4   : > { %887 = vpow2.f32 %v673_v16 }
 0x2de   : > { %v888_v17 = vpop.eup %887 }
 0x2df   : > { %v675_v18 = vadd.f32 1.0, %v888_v17 }
 0x2e1   : > { %889 = vrcp.f32 %v675_v18 }
 0x2eb   : > { %v890_v19 = vpop.eup %889 }
 0x2ec   : > { %v679_v20 = vsel %vm678_vm8, %v890_v19, 0.0 }
 0x2ed   : > { %680 = vadd.xlane.f32.xlu0 %v679_v20 }
 0x37a   : > { %v681_v21 = vpop.xlane.xlu0 %680 }
 0x37b   : > { %891 = vrcp.f32 %v681_v21 }
 0x385   : > { %v892_v22 = vpop.eup %891 }
 0x386   : > { %v683_v24 = vmul.f32 32.0, %v892_v22 }
 0x388   : > { %v684_v25 = vmul.f32 %v890_v19, %v683_v24 }
 0x38a   : > { %v688_v26 = vrot.slane %v684_v25, %v687_v23 }
 0x38c   : > { %694 = vbcast.lane.b32.xlu0 %v688_v26, 264  ;;  %690 = vbcast.lane.b32.xlu1 %v688_v26, 256 }
 0x390   : > { %698 = vbcast.lane.b32.xlu1 %v688_v26, 272 }
 0x394   : > { %702 = vbcast.lane.b32.xlu1 %v688_v26, 280 }
 0x3fe   : > { %v695_v27 = vpop.permute.xlu0 %694  ;;  %v691_v28 = vpop.permute.xlu1 %690 }
 0x3ff   : > { %v705_v29 = vmul.f32 %v695_v27, %v1012_v30  ;;  %v704_v31 = vmul.f32 %v691_v28, %v1014_v32 }
 0x401   : > { %709 = vst.msk [vmem:[%s194_s18 + $0x8] sm:$0xff] %vm546_vm2, %v705_v29  ;;  %708 = vst.msk [vmem:[%s194_s18] sm:$0xff] %vm546_vm2, %v704_v31 }
 0x402   : > { %v699_v33 = vpop.permute.xlu1 %698 }
 0x403   : > { %v706_v34 = vmul.f32 %v699_v33, %v1022_v41 }
 0x405   : > { %710 = vst.msk [vmem:[%s194_s18 + $0x10] sm:$0xff] %vm546_vm2, %v706_v34 }
 0x406   : > { %v703_v35 = vpop.permute.xlu1 %702 }
 0x407   : > { %v707_v36 = vmul.f32 %v703_v35, %v1020_v40 }
 0x409   : > { %711 = vst.msk [vmem:[%s194_s18 + $0x18] sm:$0xff] %vm546_vm2, %v707_v36 }
 0x40a PF: > { %s14_s15 = sadd.s32 1, %s899_s15  }
 0x40b   : > { %p11_p4 = scmp.ge.s32.totalorder %s14_s15, 4  }
 0x40d   :  { %13 = sbr.rel (!%p11_p4) target bundleno = 1 (0x1), region = 68 }

</bundles_post_ra>
